<compile_context>
chip_gen: v7x
topology: tpu7x:2x2x1
jax: 0.10.0
libtpu: 0.0.40
codegen_flags: <defaults>
</compile_context>

<pallas_src>
import jax
import jax.numpy as jnp
import numpy as np
from jax.experimental import pallas as pl
from jax.experimental.pallas import tpu as pltpu


# ----------------------------------------------------------------------------
# Kernel
# ----------------------------------------------------------------------------
def _done_kernel(b_ref, x_ref, w_ref, o_ref):
    # b_ref : SMEM (1,)      f32          bias of the 1-unit Linear
    # x_ref : VMEM (TM, D)   input dtype  flattened (B*T_dec, hidden) tile
    # w_ref : VMEM (1, D)    f32          Linear weight row
    # o_ref : VMEM (TM, 1)   input dtype  done probability per row
    x = x_ref[...].astype(jnp.float32)
    w = w_ref[...].astype(jnp.float32)          # (1, D) broadcasts over rows

    # z[m] = sum_d x[m, d] * w[d] + b           (VPU multiply + XLU lane reduce)
    z = jnp.sum(x * w, axis=-1, keepdims=True) + b_ref[0]

    # sigmoid(z) = 1 / (1 + exp(-z))            (EUP exp + EUP approx reciprocal)
    e = jnp.exp(-z)
    o_ref[...] = pl.reciprocal(1.0 + e, approx=True).astype(o_ref.dtype)


# ----------------------------------------------------------------------------
# Tile-size selection
# ----------------------------------------------------------------------------
def _round_up(x, m):
    return ((x + m - 1) // m) * m


def _pick_tm(M, D, itemsize):
    """Pick TM so each input block is ~4 MiB (double-buffered -> ~8 MiB VMEM),
    is a multiple of 8 rows, and the grid has >= 2 steps when M is large
    (so v7x's two TensorCores both stream)."""
    target_bytes = 4 << 20                                   # ~4 MiB / block
    tm = max(8, (target_bytes // max(D * itemsize, 1)) // 8 * 8)
    tm = min(tm, 16384)                                      # cap for tiny D
    if M <= tm:
        if M >= 2048:
            tm = _round_up(pl.cdiv(M, 2), 8)                 # >= 2 grid steps
        else:
            tm = M                                           # one full block
    return tm


# ----------------------------------------------------------------------------
# Wrapper
# ----------------------------------------------------------------------------
def done_forward(x, params):
    """x: (B, T_dec, hidden_dim) -> (B, T_dec, 1) done probabilities."""
    B, T, D = x.shape
    M = B * T

    # Metadata-only reshape: keep the native activation dtype (no host cast).
    x2 = x.reshape(M, D)
    w = params["w"].reshape(1, D).astype(jnp.float32)   # nn.Linear weight (1, D)
    b = params["b"].reshape(1).astype(jnp.float32)      # nn.Linear bias   (1,)

    TM = _pick_tm(M, D, x2.dtype.itemsize)
    grid = (pl.cdiv(M, TM),)

    out = pl.pallas_call(
        _done_kernel,
        out_shape=jax.ShapeDtypeStruct((M, 1), x.dtype),
        grid=grid,
        in_specs=[
            pl.BlockSpec(memory_space=pltpu.MemorySpace.SMEM),   # bias scalar
            pl.BlockSpec((TM, D), lambda i: (i, 0)),             # activations
            pl.BlockSpec((1, D), lambda i: (0, 0)),              # weight row
        ],
        out_specs=pl.BlockSpec((TM, 1), lambda i: (i, 0)),
        compiler_params=pltpu.CompilerParams(
            dimension_semantics=("parallel",),
            vmem_limit_bytes=32 * 1024 * 1024,
        ),
    )(b, x2, w)

    return out.reshape(B, T, 1)


# ----------------------------------------------------------------------------
# Deterministic parameter init (mirrors nn.Linear(hidden_dim, 1))
# ----------------------------------------------------------------------------
def init_params(key, hidden_dim):
    kw, kb = jax.random.split(key, 2)
    bound = 1.0 / np.sqrt(hidden_dim)
    w = jax.random.uniform(kw, (1, hidden_dim), jnp.float32, -bound, bound)
    b = jax.random.uniform(kb, (1,), jnp.float32, -bound, bound)
    return dict(w=w, b=b)


# ----------------------------------------------------------------------------
# Pure-JAX reference (mirrors the PyTorch forward exactly) for validation
# ----------------------------------------------------------------------------
def reference_forward(x, params):
    z = x @ params["w"].T + params["b"]          # (B, T_dec, 1)
    return jax.nn.sigmoid(z)


# ----------------------------------------------------------------------------
if __name__ == "__main__":
    B, T_dec, hidden_dim = 2, 8, 32

    root = jax.random.PRNGKey(0)
    kx, kp = jax.random.split(root, 2)
    x = jax.random.normal(kx, (B, T_dec, hidden_dim), jnp.float32)
    params = init_params(kp, hidden_dim)

    out = done_forward(x, params)
    out = jax.block_until_ready(out)

    ref = reference_forward(x, params)
    np.testing.assert_allclose(np.asarray(out), np.asarray(ref),
                               atol=5e-3, rtol=5e-3)
    assert out.shape == (B, T_dec, 1)

    print("KERNEL_OK")
</pallas_src>

<mosaic_0001>
module attributes {stable_mosaic.version = 11 : i64} {
  func.func @_done_kernel(%arg0: i32, %arg1: memref<1xf32, #tpu.memory_space<smem>>, %arg2: memref<16x32xf32, #tpu.memory_space<vmem>>, %arg3: memref<1x32xf32, #tpu.memory_space<vmem>>, %arg4: memref<16x1xf32, #tpu.memory_space<vmem>>) attributes {dimension_semantics = [#tpu.dimension_semantics<parallel>], iteration_bounds = array<i64: 1>, scalar_prefetch = 0 : i64, scratch_operands = 0 : i64, tpu.core_type = #tpu.core_type<tc>, window_params = [{transform_indices = @transform_0, window_bounds = array<i64: 1>}, {transform_indices = @transform_1, window_bounds = array<i64: 16, 32>}, {pipeline_mode = #tpu.pipeline_mode<synchronous>, transform_indices = @transform_2, window_bounds = array<i64: 1, 32>}, {transform_indices = @transform_3, window_bounds = array<i64: 16, 1>}]} {
    %c0 = arith.constant 0 : index
    %c0_0 = arith.constant 0 : index
    %0 = vector.load %arg2[%c0, %c0_0] : memref<16x32xf32, #tpu.memory_space<vmem>>, vector<16x32xf32>
    %c0_1 = arith.constant 0 : index
    %c0_2 = arith.constant 0 : index
    %1 = vector.load %arg3[%c0_1, %c0_2] : memref<1x32xf32, #tpu.memory_space<vmem>>, vector<1x32xf32>
    %2 = vector.broadcast %1 : vector<1x32xf32> to vector<16x32xf32>
    %3 = arith.mulf %0, %2 : vector<16x32xf32>
    %cst = arith.constant dense<0.000000e+00> : vector<16xf32>
    %4 = vector.multi_reduction <add>, %3, %cst [1] : vector<16x32xf32> to vector<16xf32>
    %5 = vector.shape_cast %4 : vector<16xf32> to vector<16x1xf32>
    %c0_3 = arith.constant 0 : index
    %6 = memref.load %arg1[%c0_3] : memref<1xf32, #tpu.memory_space<smem>>
    %7 = vector.broadcast %6 : f32 to vector<16x1xf32>
    %8 = arith.addf %5, %7 : vector<16x1xf32>
    %cst_4 = arith.constant 0.000000e+00 : f32
    %9 = vector.broadcast %cst_4 : f32 to vector<16x1xf32>
    %10 = arith.subf %9, %8 : vector<16x1xf32>
    %11 = math.exp %10 : vector<16x1xf32>
    %cst_5 = arith.constant 1.000000e+00 : f32
    %12 = vector.broadcast %cst_5 : f32 to vector<16x1xf32>
    %13 = arith.addf %12, %11 : vector<16x1xf32>
    %14 = tpu.reciprocal %13 {approx = true} : vector<16x1xf32> -> vector<16x1xf32>
    %c0_6 = arith.constant 0 : index
    %c0_7 = arith.constant 0 : index
    %15 = vector.load %arg4[%c0_6, %c0_7] : memref<16x1xf32, #tpu.memory_space<vmem>>, vector<16x1xf32>
    tpu.vector_store %arg4[%c0_6, %c0_7], %14 {strides = array<i32>} : memref<16x1xf32, #tpu.memory_space<vmem>>, vector<16x1xf32>,
    return
  }
  func.func @transform_0(%arg0: i32) -> i32 {
    %c0_i32 = arith.constant 0 : i32
    %c0_i32_0 = arith.constant 0 : i32
    return %c0_i32 : i32
  }
  func.func @transform_1(%arg0: i32) -> (i32, i32) {
    %c0_i32 = arith.constant 0 : i32
    %c0_i32_0 = arith.constant 0 : i32
    return %arg0, %c0_i32 : i32, i32
  }
  func.func @transform_2(%arg0: i32) -> (i32, i32) {
    %c0_i32 = arith.constant 0 : i32
    %c0_i32_0 = arith.constant 0 : i32
    %c0_i32_1 = arith.constant 0 : i32
    return %c0_i32, %c0_i32_0 : i32, i32
  }
  func.func @transform_3(%arg0: i32) -> (i32, i32) {
    %c0_i32 = arith.constant 0 : i32
    %c0_i32_0 = arith.constant 0 : i32
    return %arg0, %c0_i32 : i32, i32
  }
}

</mosaic_0001>

<bundles_post_ra>
// kernel: tpu_custom_call.1
= control target key start
LH: loop header
LB: loop body
LE: loop exit
PB: predicated region body
PF: predicated region fallthrough
CT: control target
= control target key end

     0   :  { %9 = vsyncpa [#allocation4], 0  ;;  %s105_s12 = smov [#allocation3]   ;;  %s152_s0 = inlined_call_operand.<no memory space> [shape: f32[1], index: 0, kind: input, shape index: {}]   ;;  %s153_s1 = inlined_call_operand.hbm [shape: f32[16,32], index: 1, kind: input, shape index: {}]   ;;  %s154_s2 = inlined_call_operand.vmem [shape: f32[1,32], index: 2, kind: input, shape index: {}]   ;;  %s155_s3 = inlined_call_operand.vmem [shape: f32[16,1], index: 3, kind: output, shape index: {}]  }
   0x1   :  { %s17_s13 = sshll.u32 %s105_s12, 4  ;;  %s81_s16 = scalar_lea.hbm %s153_s1, 256  ;;  %s18_s13 = int_to_ptr.vmem [resolvable:$true] %s17_s13 }
   0x2   :  { %p82_p0 = scmp.ne.s32.totalorder %s153_s1, %s81_s16  ;;  %p85_p1 = scmp.lt.u32.totalorder %s81_s16, %s153_s1 }
   0x4   :  { %p87_p2 = pnand %p85_p1, %p82_p0 }
   0x6   :  { %90 = shalt.err (!%p87_p2)
}
   0x7   :  { %s91_s21 = scalar_lea.vmem %s18_s13, 256  ;;  %p96_p4 = scmp.lt.s32.totalorder %s18_s13, %s18_s13 }
   0x8   :  { %p92_p3 = scmp.ne.s32.totalorder %s18_s13, %s91_s21  ;;  %p97_p5 = scmp.lt.s32.totalorder %s91_s21, %s91_s21 }
   0xa   :  { %p98_p6 = por %p97_p5, %p96_p4 }
   0xc   :  { %p99_p7 = pnand %p98_p6, %p92_p3 }
   0xe   :  { %102 = shalt.err (!%p99_p7)
}
   0xf   :  { %s106_s22 = smov 128   ;;  %s107_s23 = smov 8  }
  0x10   :  { %23 = dma.hbm_to_vmem [thread:$0]  %s153_s1, 256, %s18_s13, [#allocation4], %s106_s22, %s106_s22, %s107_s23  }
  0x11   :  { %103 = dma.done.wait [#allocation4], 256  }
  0x12   :  { %104 = vsyncadd [#allocation4], 4294967040  ;;  %v29_v0 = vld [vmem:[#allocation3] sm:$0xff]  ;;  %vm40_vm0 = vcmask 261120   ;;  %v30_v2 = vld [vmem:[#allocation3 + $0x8] sm:$0xff]  ;;  %v48_v7 = vstv %s152_s0  ;;  %vm61_vm1 = vcmask 7168  }
  0x13   :  { %v69_v1 = vld [vmem:[%s154_s2] ss:$0 sm:$0xff] }
  0x14   :  { %v38_v3 = vmul.f32 %v69_v1, %v29_v0  ;;  %v39_v4 = vmul.f32 %v69_v1, %v30_v2 }
  0x16   :  { %v41_v5 = vsel %vm40_vm0, %v38_v3, 0.0  ;;  %v44_v6 = vsel %vm40_vm0, %v39_v4, 0.0 }
  0x17   :  { %42 = vadd.xlane.f32.xlu0 %v41_v5 }
  0x1b   :  { %45 = vadd.xlane.f32.xlu0 %v44_v6 }
  0xa4   :  { %v43_v8 = vpop.xlane.xlu0 %42 }
  0xa5   :  { %v49_v9 = vadd.f32 %v48_v7, %v43_v8 }
  0xa7   :  { %v51_v10 = vsub.f32 0.0, %v49_v9 }
  0xa8   :  { %v46_v11 = vpop.xlane.xlu0 %45 }
  0xa9   :  { %v53_v12 = vmul.f32 1.442695, %v51_v10  ;;  %v50_v13 = vadd.f32 %v48_v7, %v46_v11 }
  0xab   :  { %73 = vpow2.f32 %v53_v12  ;;  %v52_v14 = vsub.f32 0.0, %v50_v13 }
  0xad   :  { %v55_v15 = vmul.f32 1.442695, %v52_v14 }
  0xaf   :  { %75 = vpow2.f32 %v55_v15 }
  0xb5   :  { %v74_v16 = vpop.eup %73 }
  0xb6   :  { %v57_v17 = vadd.f32 1.0, %v74_v16 }
  0xb8   :  { %77 = vrcp.f32 %v57_v17 }
  0xb9   :  { %v76_v18 = vpop.eup %75 }
  0xba   :  { %v58_v19 = vadd.f32 1.0, %v76_v18 }
  0xbc   :  { %79 = vrcp.f32 %v58_v19 }
  0xc2   :  { %v78_v20 = vpop.eup %77 }
  0xc3   :  { %62 = vst.msk [vmem:[%s155_s3] sm:$0xff] %vm61_vm1, %v78_v20 }
  0xc6   :  { %v80_v21 = vpop.eup %79 }
  0xc7   :  { %63 = vst.msk [vmem:[%s155_s3 + $0x8] sm:$0xff] %vm61_vm1, %v80_v21 }
  0xc8   :  { %68 = vsyncpa [#allocation4], 1 }

</bundles_post_ra>
